<compile_context>
chip_gen: v6e
topology: v6e:2x2x1
jax: 0.10.0
libtpu: 0.0.40
codegen_flags: <defaults>
</compile_context>

<pallas_src>
import functools

import jax
import jax.numpy as jnp
from jax.experimental import pallas as pl
from jax.experimental.pallas import tpu as pltpu

LANES = 128
TARGET_BLOCK_BYTES = 4 * 1024 * 1024   # per input per pipeline buffer
NUM_CORES_MAX = 2                      # v7x has 2 TCs; size-1 axis elsewhere is free


def _hinge_kernel(x_ref, t_ref, o_ref, *, margin, blocks_per_core, last_block,
                  n_last, block_rows):
    c = pl.program_id(0)          # core axis ("parallel")
    i = pl.program_id(1)          # block axis ("arbitrary")
    g = c * blocks_per_core + i   # global block index

    @pl.when(i == 0)
    def _():
        o_ref[...] = jnp.zeros_like(o_ref)

    x = x_ref[...].astype(jnp.float32)
    t = t_ref[...].astype(jnp.float32)
    h = jnp.maximum(jnp.float32(margin) - t * x, jnp.float32(0.0))

    full_block_elems = block_rows * LANES
    if n_last == full_block_elems:
        # Every block is fully valid: no masking anywhere. The g <= last_block
        # gate only skips the (at most one) clamped duplicate grid entry that
        # appears when num_blocks is not a multiple of the core count.
        @pl.when(g <= last_block)
        def _():
            o_ref[...] += jnp.sum(h, axis=0, keepdims=True)[None]
    else:
        @pl.when(g < last_block)
        def _():
            o_ref[...] += jnp.sum(h, axis=0, keepdims=True)[None]

        @pl.when(g == last_block)
        def _():
            # Ragged final block: mask the <=127-element lane tail and the
            # Pallas-padded rows.  Runs exactly once, so the iota/select cost
            # never appears in the steady-state loop.  Block-local index keeps
            # the comparison safely inside int32 for arbitrarily large inputs.
            row = jax.lax.broadcasted_iota(jnp.int32, h.shape, 0)
            lane = jax.lax.broadcasted_iota(jnp.int32, h.shape, 1)
            lidx = row * LANES + lane
            hm = jnp.where(lidx < n_last, h, jnp.float32(0.0))
            o_ref[...] += jnp.sum(hm, axis=0, keepdims=True)[None]


def hinge_loss(x, t, *, margin=1.0, size_average=True, sign=1.0):
    """Pallas implementation of HingeLoss.forward. Returns a scalar float32."""
    x = jnp.asarray(x).reshape(-1)
    t = jnp.asarray(t).reshape(-1)
    n = int(x.size)
    assert n > 0, "empty input"
    assert int(t.size) == n, "input and target must have the same numel"

    rows = -(-n // LANES)
    n_row_pad = rows * LANES
    if n_row_pad != n:
        # Pad values are irrelevant: the final-block mask excludes them.
        x = jnp.pad(x, (0, n_row_pad - n))
        t = jnp.pad(t, (0, n_row_pad - n))
    x2 = x.reshape(rows, LANES)
    t2 = t.reshape(rows, LANES)

    # Dtype-aware block sizing (byte budget, not fixed row count).
    itemsize = max(x2.dtype.itemsize, t2.dtype.itemsize)
    budget_rows = max(32, (TARGET_BLOCK_BYTES // (LANES * itemsize)) // 32 * 32)
    if rows <= budget_rows:
        block_rows = rows            # full-dim block: always a legal shape
    else:
        block_rows = budget_rows     # multiple of 32: legal for any dtype

    num_blocks = -(-rows // block_rows)
    num_cores = NUM_CORES_MAX if num_blocks >= NUM_CORES_MAX else 1
    bpc = -(-num_blocks // num_cores)          # blocks per core
    last_block = num_blocks - 1
    n_last = n - last_block * block_rows * LANES   # valid elems in final block

    scale = (1.0 / n) if size_average else 1.0

    kernel = functools.partial(
        _hinge_kernel,
        margin=float(margin),
        blocks_per_core=int(bpc),
        last_block=int(last_block),
        n_last=int(n_last),
        block_rows=int(block_rows),
    )

    def in_map(c, i):
        # Clamp so the padded grid entry (num_blocks % num_cores != 0) stays
        # in bounds; its contribution is gated off inside the kernel.
        return (jnp.minimum(c * bpc + i, last_block), 0)

    partials = pl.pallas_call(
        kernel,
        out_shape=jax.ShapeDtypeStruct((num_cores, 1, LANES), jnp.float32),
        grid_spec=pltpu.PrefetchScalarGridSpec(
            num_scalar_prefetch=0,
            grid=(num_cores, bpc),
            in_specs=[
                pl.BlockSpec((block_rows, LANES), in_map),
                pl.BlockSpec((block_rows, LANES), in_map),
            ],
            out_specs=pl.BlockSpec((1, 1, LANES), lambda c, i: (c, 0, 0)),
        ),
        compiler_params=pltpu.CompilerParams(
            dimension_semantics=("parallel", "arbitrary"),
            vmem_limit_bytes=32 * 1024 * 1024,
        ),
    )(x2, t2)

    # Tiny epilogue in plain JAX: cross-lane + cross-core sum, scale, sign.
    return jnp.sum(partials) * jnp.float32(scale * sign)


def hinge_loss_ref(x, t, *, margin=1.0, size_average=True, sign=1.0):
    x = jnp.asarray(x, jnp.float32).reshape(-1)
    t = jnp.asarray(t, jnp.float32).reshape(-1)
    out = margin - t * x
    out = jnp.where(out > 0.0, out, 0.0)
    if size_average:
        out = out / x.size
    return jnp.sum(out) * sign


if __name__ == "__main__":
    key = jax.random.PRNGKey(0)
    k1, k2, k3, k4, k5, k6 = jax.random.split(key, 6)

    # Small shape consistent with a typical use of the module.
    x = jax.random.normal(k1, (2, 4, 16, 16), dtype=jnp.float32)
    target = jnp.where(jax.random.bernoulli(k2, 0.5, (2, 4, 16, 16)), 1.0, -1.0)

    res = hinge_loss(x, target, margin=1.0, size_average=True, sign=1.0)
    res = jax.block_until_ready(res)
    ref = hinge_loss_ref(x, target, margin=1.0, size_average=True, sign=1.0)
    assert jnp.allclose(res, ref, rtol=1e-5, atol=1e-6), (res, ref)

    # Ragged multi-block size: exercises the 2-way core split (odd block count
    # -> one clamped/padded grid entry) and the masked final block.
    n_ragged = 2 * 8192 * LANES + 500
    x_r = jax.random.normal(k3, (n_ragged,), dtype=jnp.float32)
    t_r = jnp.where(jax.random.bernoulli(k4, 0.5, (n_ragged,)), 1.0, -1.0)
    res_r = hinge_loss(x_r, t_r, margin=0.7, size_average=True, sign=-1.0)
    res_r = jax.block_until_ready(res_r)
    ref_r = hinge_loss_ref(x_r, t_r, margin=0.7, size_average=True, sign=-1.0)
    assert jnp.allclose(res_r, ref_r, rtol=1e-4, atol=1e-6), (res_r, ref_r)

    # bf16 inputs: native dtype streamed from HBM, widened on-chip; dtype-aware
    # block sizing keeps the same per-step byte budget.
    x_b = jax.random.normal(k5, (3, 1000), dtype=jnp.bfloat16)
    t_b = jnp.where(jax.random.bernoulli(k6, 0.5, (3, 1000)),
                    jnp.bfloat16(1.0), jnp.bfloat16(-1.0))
    res_b = hinge_loss(x_b, t_b, margin=1.0, size_average=False, sign=1.0)
    res_b = jax.block_until_ready(res_b)
    ref_b = hinge_loss_ref(x_b, t_b, margin=1.0, size_average=False, sign=1.0)
    assert jnp.allclose(res_b, ref_b, rtol=2e-3, atol=1e-3), (res_b, ref_b)

    print("KERNEL_OK")
</pallas_src>

<mosaic_0001>
module attributes {stable_mosaic.version = 11 : i64} {
  func.func @_hinge_kernel(%arg0: i32, %arg1: i32, %arg2: memref<16x128xf32, #tpu.memory_space<vmem>>, %arg3: memref<16x128xf32, #tpu.memory_space<vmem>>, %arg4: memref<1x1x128xf32, #tpu.memory_space<vmem>>) attributes {dimension_semantics = [#tpu.dimension_semantics<parallel>, #tpu.dimension_semantics<arbitrary>], iteration_bounds = array<i64: 1, 1>, scalar_prefetch = 0 : i64, scratch_operands = 0 : i64, tpu.core_type = #tpu.core_type<tc>, window_params = [{transform_indices = @transform_0, window_bounds = array<i64: 16, 128>}, {transform_indices = @transform_1, window_bounds = array<i64: 16, 128>}, {transform_indices = @transform_2, window_bounds = array<i64: 1, 1, 128>}]} {
    %c1_i32 = arith.constant 1 : i32
    %0 = arith.muli %arg0, %c1_i32 : i32
    %1 = arith.addi %0, %arg1 : i32
    %c0_i32 = arith.constant 0 : i32
    %2 = arith.cmpi eq, %arg1, %c0_i32 : i32
    %3 = arith.extui %2 : i1 to i32
    %c0_i32_0 = arith.constant 0 : i32
    %4 = arith.cmpi ne, %3, %c0_i32_0 : i32
    scf.if %4 {
      %cst_7 = arith.constant 0.000000e+00 : f32
      %15 = vector.broadcast %cst_7 : f32 to vector<1x1x128xf32>
      %c0_8 = arith.constant 0 : index
      %c0_9 = arith.constant 0 : index
      %c0_10 = arith.constant 0 : index
      %16 = vector.load %arg4[%c0_8, %c0_9, %c0_10] : memref<1x1x128xf32, #tpu.memory_space<vmem>>, vector<1x1x128xf32>
      tpu.vector_store %arg4[%c0_8, %c0_9, %c0_10], %15 {strides = array<i32>} : memref<1x1x128xf32, #tpu.memory_space<vmem>>, vector<1x1x128xf32>,
    } else {
    }
    %c0 = arith.constant 0 : index
    %c0_1 = arith.constant 0 : index
    %5 = vector.load %arg2[%c0, %c0_1] : memref<16x128xf32, #tpu.memory_space<vmem>>, vector<16x128xf32>
    %c0_2 = arith.constant 0 : index
    %c0_3 = arith.constant 0 : index
    %6 = vector.load %arg3[%c0_2, %c0_3] : memref<16x128xf32, #tpu.memory_space<vmem>>, vector<16x128xf32>
    %7 = arith.mulf %6, %5 : vector<16x128xf32>
    %cst = arith.constant 1.000000e+00 : f32
    %8 = vector.broadcast %cst : f32 to vector<16x128xf32>
    %9 = arith.subf %8, %7 : vector<16x128xf32>
    %cst_4 = arith.constant 0.000000e+00 : f32
    %10 = vector.broadcast %cst_4 : f32 to vector<16x128xf32>
    %11 = arith.maximumf %9, %10 : vector<16x128xf32>
    %c0_i32_5 = arith.constant 0 : i32
    %12 = arith.cmpi sle, %1, %c0_i32_5 : i32
    %13 = arith.extui %12 : i1 to i32
    %c0_i32_6 = arith.constant 0 : i32
    %14 = arith.cmpi ne, %13, %c0_i32_6 : i32
    scf.if %14 {
      %c0_7 = arith.constant 0 : index
      %c0_8 = arith.constant 0 : index
      %c0_9 = arith.constant 0 : index
      %15 = vector.load %arg4[%c0_7, %c0_8, %c0_9] : memref<1x1x128xf32, #tpu.memory_space<vmem>>, vector<1x1x128xf32>
      %cst_10 = arith.constant dense<0.000000e+00> : vector<128xf32>
      %16 = vector.multi_reduction <add>, %11, %cst_10 [0] : vector<16x128xf32> to vector<128xf32>
      %17 = vector.shape_cast %16 : vector<128xf32> to vector<1x128xf32>
      %18 = vector.shape_cast %17 : vector<1x128xf32> to vector<1x1x128xf32>
      %19 = arith.addf %15, %18 : vector<1x1x128xf32>
      %c0_11 = arith.constant 0 : index
      %c0_12 = arith.constant 0 : index
      %c0_13 = arith.constant 0 : index
      %20 = vector.load %arg4[%c0_11, %c0_12, %c0_13] : memref<1x1x128xf32, #tpu.memory_space<vmem>>, vector<1x1x128xf32>
      tpu.vector_store %arg4[%c0_11, %c0_12, %c0_13], %19 {strides = array<i32>} : memref<1x1x128xf32, #tpu.memory_space<vmem>>, vector<1x1x128xf32>,
    } else {
    }
    return
  }
  func.func @transform_0(%arg0: i32, %arg1: i32) -> (i32, i32) {
    %c1_i32 = arith.constant 1 : i32
    %0 = arith.muli %arg0, %c1_i32 : i32
    %1 = arith.addi %0, %arg1 : i32
    %c0_i32 = arith.constant 0 : i32
    %2 = arith.minsi %1, %c0_i32 : i32
    %c0_i32_0 = arith.constant 0 : i32
    %c0_i32_1 = arith.constant 0 : i32
    return %2, %c0_i32_0 : i32, i32
  }
  func.func @transform_1(%arg0: i32, %arg1: i32) -> (i32, i32) {
    %c1_i32 = arith.constant 1 : i32
    %0 = arith.muli %arg0, %c1_i32 : i32
    %1 = arith.addi %0, %arg1 : i32
    %c0_i32 = arith.constant 0 : i32
    %2 = arith.minsi %1, %c0_i32 : i32
    %c0_i32_0 = arith.constant 0 : i32
    %c0_i32_1 = arith.constant 0 : i32
    return %2, %c0_i32_0 : i32, i32
  }
  func.func @transform_2(%arg0: i32, %arg1: i32) -> (i32, i32, i32) {
    %c0_i32 = arith.constant 0 : i32
    %c0_i32_0 = arith.constant 0 : i32
    %c0_i32_1 = arith.constant 0 : i32
    return %arg0, %c0_i32, %c0_i32_0 : i32, i32, i32
  }
}

</mosaic_0001>

<bundles_post_ra>
// kernel: tpu_custom_call.1
= control target key start
LH: loop header
LB: loop body
LE: loop exit
PB: predicated region body
PF: predicated region fallthrough
CT: control target
= control target key end

     0   :  { %7 = vsyncpa [#allocation3], 0  ;;  %s212_s0 = inlined_call_operand.hbm [shape: f32[16,128], index: 0, kind: input, shape index: {}]   ;;  %s213_s1 = inlined_call_operand.hbm [shape: f32[16,128], index: 1, kind: input, shape index: {}]   ;;  %s214_s2 = inlined_call_operand.hbm [shape: f32[1,1,128], index: 2, kind: output, shape index: {}]  }
   0x1   :  { %8 = vsyncpa [#allocation6], 0 }
   0x2   :  { %9 = vsyncpa [#allocation4], 0  ;;  %s182_s9 = smov [#allocation2]  }
   0x3   :  { %s21_s10 = sshll.u32 %s182_s9, 4  ;;  %s22_s10 = int_to_ptr.vmem [resolvable:$true] %s21_s10 }
   0x4   :  { %s124_s11 = scalar_lea.vmem %s22_s10, 256  ;;  %p129_p1 = scmp.lt.s32.totalorder %s22_s10, %s22_s10 }
   0x5   :  { %p125_p0 = scmp.ne.s32.totalorder %s22_s10, %s124_s11  ;;  %p130_p2 = scmp.lt.s32.totalorder %s124_s11, %s124_s11 }
   0x7   :  { %p131_p3 = por %p130_p2, %p129_p1 }
   0x9   :  { %p132_p4 = pnand %p131_p3, %p125_p0 }
   0xb   :  { %135 = shalt.err (!%p132_p4)
}
   0xc   :  { %s183_s12 = smov 128   ;;  %s184_s13 = smov 8  }
   0xd   :  { %27 = dma.hbm_to_vmem [thread:$0]  %s212_s0, 256, %s22_s10, [#allocation3], %s183_s12, %s183_s12, %s184_s13  }
   0xe   :  { %s185_s16 = smov [#allocation5]  }
   0xf   :  { %s39_s17 = sshll.u32 %s185_s16, 4  ;;  %s40_s17 = int_to_ptr.vmem [resolvable:$true] %s39_s17 }
  0x10   :  { %s144_s18 = scalar_lea.vmem %s40_s17, 256  ;;  %p149_p6 = scmp.lt.s32.totalorder %s40_s17, %s40_s17 }
  0x11   :  { %p145_p5 = scmp.ne.s32.totalorder %s40_s17, %s144_s18  ;;  %p150_p7 = scmp.lt.s32.totalorder %s144_s18, %s144_s18 }
  0x13   :  { %p151_p8 = por %p150_p7, %p149_p6 }
  0x15   :  { %p152_p9 = pnand %p151_p8, %p145_p5 }
  0x17   :  { %155 = shalt.err (!%p152_p9)
}
  0x18   :  { %45 = dma.hbm_to_vmem [thread:$0]  %s213_s1, 256, %s40_s17, [#allocation6], %s183_s12, %s183_s12, %s184_s13  }
  0x19   :  { %176 = dma.done.wait [#allocation3], 256  }
  0x1a   :  { %177 = vsyncadd [#allocation3], 4294967040 }
  0x1b   :  { %178 = dma.done.wait [#allocation6], 256  }
  0x1c   :  { %179 = vsyncadd [#allocation6], 4294967040  ;;  %v186_v0 = vmov 0.0   ;;  %v66_v1 = vld [vmem:[#allocation2] sm:$0xff]  ;;  %v67_v2 = vld [vmem:[#allocation2 + $0x8] sm:$0xff]  ;;  %s187_s0 = smov [#allocation7]  }
  0x1d   :  { %65 = vst [vmem:[#allocation7] sm:$0x1] %v186_v0  ;;  %v68_v3 = vld [vmem:[#allocation5] sm:$0xff]  ;;  %v69_v4 = vld [vmem:[#allocation5 + $0x8] sm:$0xff]  ;;  %s96_s1 = sshll.u32 %s187_s0, 4  ;;  %s97_s1 = int_to_ptr.vmem [resolvable:$true] %s96_s1 }
  0x1e   :  { %v70_v5 = vmul.f32 %v68_v3, %v66_v1  ;;  %v71_v6 = vmul.f32 %v69_v4, %v67_v2  ;;  %s156_s21 = scalar_lea.vmem %s97_s1, 16  ;;  %s160_s22 = scalar_lea.vmem %s97_s1, 32 }
  0x1f   :  { %p157_p10 = scmp.ne.s32.totalorder %s97_s1, %s156_s21  ;;  %p161_p11 = scmp.lt.s32.totalorder %s97_s1, %s97_s1 }
  0x20   :  { %v72_v7 = vsub.f32 1.0, %v70_v5  ;;  %v73_v8 = vsub.f32 1.0, %v71_v6  ;;  %p162_p12 = scmp.lt.s32.totalorder %s160_s22, %s156_s21 }
  0x22   :  { %v74_v9 = vmax.f32 %v72_v7, 0.0  ;;  %v75_v10 = vmax.f32 %v73_v8, 0.0  ;;  %p163_p13 = por %p162_p12, %p161_p11 }
  0x24   :  { %v81_v11 = vadd.f32 %v75_v10, %v74_v9  ;;  %v80_v17 = vld [vmem:[#allocation7] sm:$0x1]  ;;  %p164_p0 = pnand %p163_p13, %p157_p10 }
  0x26   :  { %v82_v12 = vrot.slane %v81_v11, 4 }
  0x28   :  { %v83_v13 = vadd.f32 %v82_v12, %v81_v11 }
  0x2a   :  { %v84_v14 = vrot.slane %v83_v13, 2 }
  0x2c   :  { %v85_v15 = vadd.f32 %v84_v14, %v83_v13 }
  0x2e   :  { %v86_v16 = vrot.slane %v85_v15, 1 }
  0x30   :  { %v87_v18 = vadd.f32 %v86_v16, %v85_v15 }
  0x32   :  { %v88_v19 = vadd.f32 %v87_v18, %v80_v17 }
  0x34   :  { %89 = vst [vmem:[#allocation7] sm:$0x1] %v88_v19 }
  0x35   :  { %167 = shalt.err (!%p164_p0)
}
  0x36   :  { %99 = dma.vmem_to_hbm [thread:$0]  %s97_s1, 16, %s214_s2, [#allocation4]  }
  0x37   :  { %180 = dma.done.wait [#allocation4], 16  }
  0x38   :  { %181 = vsyncadd [#allocation4], 4294967280 }
  0x39   :  { %103 = vsyncpa [#allocation3], 1 }
  0x3a   :  { %104 = vsyncpa [#allocation6], 1 }
  0x3b   :  { %105 = vsyncpa [#allocation4], 1 }

</bundles_post_ra>
